<compile_context>
chip_gen: v5e
topology: v5e:2x2
jax: 0.10.0
libtpu: 0.0.40
codegen_flags: <defaults>
</compile_context>

<pallas_src>
import jax
import jax.numpy as jnp
from jax.experimental import pallas as pl
from jax.experimental.pallas import tpu as pltpu


def _make_rnn_seq_kernel(T, B, size_in, size_middle, size_out):
    """Kernel factory: closes over static shapes (T, B, dims)."""

    def kernel(xs_ref, hx_ref, wcell_ref, bcell_ref, wheads_ref, bheads_ref,
               heads_ref, hfinal_ref, h_all_scr):
        # Hoist resident operands out of the loop (loaded once from VMEM).
        w_cell = wcell_ref[...]          # (size_in + size_middle, size_middle)
        b_cell = bcell_ref[...]          # (1, size_middle)

        h = hx_ref[...].astype(jnp.float32)          # (B, size_middle) carry

        # Fully unrolled recurrence: the only serial work is matmul+bias+tanh.
        for t in range(T):
            x_t = xs_ref[t]                           # (B, size_in), static index
            xh = jnp.concatenate([x_t, h], axis=-1)   # (B, size_in+size_middle)
            pre = jnp.dot(xh, w_cell,
                          preferred_element_type=jnp.float32) + b_cell
            h = jnp.tanh(pre)
            # Aligned static store (B is a multiple of 8 sublanes).
            h_all_scr[t * B:(t + 1) * B, :] = h

        # Both heads for ALL timesteps in one matmul, off the critical path.
        h_all = h_all_scr[...]                        # (T*B, size_middle)
        heads = jnp.dot(h_all, wheads_ref[...],
                        preferred_element_type=jnp.float32) + bheads_ref[...]
        heads_ref[...] = heads.astype(heads_ref.dtype)      # (T*B, 2*size_out)
        hfinal_ref[...] = h.astype(hfinal_ref.dtype)         # written once

    return kernel


@jax.jit
def rnn_model_sequence_forward(xs, hx, params):
    """Run T steps of Rnn_Model.forward in a single pallas_call invocation.

    xs : (T, B, size_in)   hx : (B, size_middle)
    Returns (sp_seq (T,B,size_out), tp_seq (T,B,size_out), final_hx (B,size_middle)).
    """
    T, B, size_in = xs.shape
    size_middle = params["w_hh"].shape[0]
    size_out = params["w_sp"].shape[0]

    # Wrapper-side parameter prep (pure layout work, traced once under jit):
    #   - stack W_ih^T / W_hh^T -> one (in+mid, mid) matrix (one MXU push/step),
    #   - fold the two RNN biases into one row,
    #   - fuse the two head weights/biases into one wide matmul.
    w_cell = jnp.concatenate([params["w_ih"].T, params["w_hh"].T], axis=0)     # (in+mid, mid)
    b_cell = (params["b_ih"] + params["b_hh"]).reshape(1, -1)                  # (1, mid)
    w_heads = jnp.concatenate([params["w_sp"].T, params["w_tp"].T], axis=1)    # (mid, 2*out)
    b_heads = jnp.concatenate([params["b_sp"], params["b_tp"]]).reshape(1, -1) # (1, 2*out)

    flops = (2 * T * B * (size_in + size_middle) * size_middle
             + 2 * T * B * size_middle * 2 * size_out)
    bytes_accessed = 4 * (xs.size + hx.size + w_cell.size + b_cell.size
                          + w_heads.size + b_heads.size
                          + T * B * 2 * size_out + B * size_middle)

    vmem = pl.BlockSpec(memory_space=pltpu.MemorySpace.VMEM)

    heads_flat, h_final = pl.pallas_call(
        _make_rnn_seq_kernel(T, B, size_in, size_middle, size_out),
        out_shape=(
            jax.ShapeDtypeStruct((T * B, 2 * size_out), jnp.float32),
            jax.ShapeDtypeStruct((B, size_middle), jnp.float32),
        ),
        in_specs=[vmem] * 6,
        out_specs=(vmem, vmem),
        scratch_shapes=[pltpu.VMEM((T * B, size_middle), jnp.float32)],
        cost_estimate=pl.CostEstimate(
            flops=flops,
            transcendentals=T * B * size_middle,
            bytes_accessed=bytes_accessed),
    )(xs, hx, w_cell, b_cell, w_heads, b_heads)

    # Lane-dense fused output is split back into (sp, tp) here, outside the kernel.
    heads = heads_flat.reshape(T, B, 2 * size_out)
    sp_seq = heads[..., :size_out]
    tp_seq = heads[..., size_out:]
    return sp_seq, tp_seq, h_final


def rnn_model_forward(x, hx, params):
    """Single-step forward matching the PyTorch module exactly: (sp, tp, new_hx)."""
    sp_seq, tp_seq, h_final = rnn_model_sequence_forward(x[None], hx, params)
    return sp_seq[0], tp_seq[0], h_final


def init_params(key, size_in=16, size_middle=32, size_out=3):
    """Deterministic parameter init (uniform, PyTorch-style bounds)."""
    ks = jax.random.split(key, 8)
    bound = 1.0 / jnp.sqrt(size_middle)
    u = lambda k, shape: jax.random.uniform(k, shape, jnp.float32, -bound, bound)
    return {
        "w_ih": u(ks[0], (size_middle, size_in)),
        "w_hh": u(ks[1], (size_middle, size_middle)),
        "b_ih": u(ks[2], (size_middle,)),
        "b_hh": u(ks[3], (size_middle,)),
        "w_sp": u(ks[4], (size_out, size_middle)),
        "b_sp": u(ks[5], (size_out,)),
        "w_tp": u(ks[6], (size_out, size_middle)),
        "b_tp": u(ks[7], (size_out,)),
    }


def reference_sequence(xs, hx, params):
    """Pure-JAX reference: T calls of the PyTorch forward via lax.scan."""
    def step(h, x):
        pre = (x @ params["w_ih"].T + params["b_ih"]
               + h @ params["w_hh"].T + params["b_hh"])
        h_new = jnp.tanh(pre)
        sp = h_new @ params["w_sp"].T + params["b_sp"]
        tp = h_new @ params["w_tp"].T + params["b_tp"]
        return h_new, (sp, tp)
    h_final, (sp_seq, tp_seq) = jax.lax.scan(step, hx, xs)
    return sp_seq, tp_seq, h_final


if __name__ == "__main__":
    size_in, size_middle, size_out = 16, 32, 3
    batch, seq_len = 8, 8   # batch kept a multiple of 8 (f32 sublane granularity)

    key = jax.random.PRNGKey(0)
    k_params, k_x = jax.random.split(key)
    params = init_params(k_params, size_in, size_middle, size_out)

    xs = jax.random.normal(k_x, (seq_len, batch, size_in), jnp.float32)
    hx = jnp.zeros((batch, size_middle), jnp.float32)   # self.hx init

    # Fused-sequence kernel (T steps, one pallas_call, no grid).
    sp_seq, tp_seq, h_final = rnn_model_sequence_forward(xs, hx, params)
    jax.block_until_ready((sp_seq, tp_seq, h_final))

    sp_ref, tp_ref, h_ref = reference_sequence(xs, hx, params)
    assert jnp.allclose(sp_seq, sp_ref, atol=1e-5, rtol=1e-5)
    assert jnp.allclose(tp_seq, tp_ref, atol=1e-5, rtol=1e-5)
    assert jnp.allclose(h_final, h_ref, atol=1e-5, rtol=1e-5)

    # Single-step wrapper (exact PyTorch forward signature semantics).
    sp1, tp1, hx1 = rnn_model_forward(xs[0], hx, params)
    jax.block_until_ready((sp1, tp1, hx1))
    assert jnp.allclose(sp1, sp_ref[0], atol=1e-5, rtol=1e-5)
    assert jnp.allclose(tp1, tp_ref[0], atol=1e-5, rtol=1e-5)
    assert jnp.allclose(hx1, h_ref[0] if False else jnp.tanh(
        xs[0] @ params["w_ih"].T + params["b_ih"]
        + hx @ params["w_hh"].T + params["b_hh"]), atol=1e-5, rtol=1e-5)

    print("KERNEL_OK")
</pallas_src>

<mosaic_0001>
module attributes {stable_mosaic.version = 11 : i64} {
  func.func @kernel(%arg0: memref<8x8x16xf32, #tpu.memory_space<vmem>>, %arg1: memref<8x32xf32, #tpu.memory_space<vmem>>, %arg2: memref<48x32xf32, #tpu.memory_space<vmem>>, %arg3: memref<1x32xf32, #tpu.memory_space<vmem>>, %arg4: memref<32x6xf32, #tpu.memory_space<vmem>>, %arg5: memref<1x6xf32, #tpu.memory_space<vmem>>, %arg6: memref<64x6xf32, #tpu.memory_space<vmem>>, %arg7: memref<8x32xf32, #tpu.memory_space<vmem>>, %arg8: memref<64x32xf32, #tpu.memory_space<vmem>>) attributes {dimension_semantics = [], scalar_prefetch = 0 : i64, scratch_operands = 1 : i64, tpu.core_type = #tpu.core_type<tc>} {
    %c0 = arith.constant 0 : index
    %c0_0 = arith.constant 0 : index
    %0 = vector.load %arg2[%c0, %c0_0] : memref<48x32xf32, #tpu.memory_space<vmem>>, vector<48x32xf32>
    %c0_1 = arith.constant 0 : index
    %c0_2 = arith.constant 0 : index
    %1 = vector.load %arg3[%c0_1, %c0_2] : memref<1x32xf32, #tpu.memory_space<vmem>>, vector<1x32xf32>
    %c0_3 = arith.constant 0 : index
    %c0_4 = arith.constant 0 : index
    %2 = vector.load %arg1[%c0_3, %c0_4] : memref<8x32xf32, #tpu.memory_space<vmem>>, vector<8x32xf32>
    %c0_5 = arith.constant 0 : index
    %c0_6 = arith.constant 0 : index
    %c0_7 = arith.constant 0 : index
    %3 = vector.load %arg0[%c0_5, %c0_6, %c0_7] : memref<8x8x16xf32, #tpu.memory_space<vmem>>, vector<1x8x16xf32>
    %4 = vector.shape_cast %3 : vector<1x8x16xf32> to vector<8x16xf32>
    %5 = tpu.concatenate %4, %2 in 1 : vector<8x16xf32>, vector<8x32xf32> -> vector<8x48xf32>
    %cst = arith.constant dense<0.000000e+00> : vector<8x32xf32>
    %6 = tpu.matmul %5, %0, %cst {dimension_numbers = #tpu.dot_dimension_numbers<[1], [0], [0], [1], [0, 0, 1, 1], [], []>} : vector<8x48xf32>, vector<48x32xf32>, vector<8x32xf32> -> vector<8x32xf32>
    %7 = vector.broadcast %1 : vector<1x32xf32> to vector<8x32xf32>
    %8 = arith.addf %6, %7 : vector<8x32xf32>
    %9 = math.tanh %8 : vector<8x32xf32>
    %c0_8 = arith.constant 0 : index
    %c0_9 = arith.constant 0 : index
    %10 = vector.load %arg8[%c0_8, %c0_9] : memref<64x32xf32, #tpu.memory_space<vmem>>, vector<8x32xf32>
    tpu.vector_store %arg8[%c0_8, %c0_9], %9 {strides = array<i32>} : memref<64x32xf32, #tpu.memory_space<vmem>>, vector<8x32xf32>,
    %c1 = arith.constant 1 : index
    %c0_10 = arith.constant 0 : index
    %c0_11 = arith.constant 0 : index
    %11 = vector.load %arg0[%c1, %c0_10, %c0_11] : memref<8x8x16xf32, #tpu.memory_space<vmem>>, vector<1x8x16xf32>
    %12 = vector.shape_cast %11 : vector<1x8x16xf32> to vector<8x16xf32>
    %13 = tpu.concatenate %12, %9 in 1 : vector<8x16xf32>, vector<8x32xf32> -> vector<8x48xf32>
    %cst_12 = arith.constant dense<0.000000e+00> : vector<8x32xf32>
    %14 = tpu.matmul %13, %0, %cst_12 {dimension_numbers = #tpu.dot_dimension_numbers<[1], [0], [0], [1], [0, 0, 1, 1], [], []>} : vector<8x48xf32>, vector<48x32xf32>, vector<8x32xf32> -> vector<8x32xf32>
    %15 = vector.broadcast %1 : vector<1x32xf32> to vector<8x32xf32>
    %16 = arith.addf %14, %15 : vector<8x32xf32>
    %17 = math.tanh %16 : vector<8x32xf32>
    %c8 = arith.constant 8 : index
    %c0_13 = arith.constant 0 : index
    %18 = vector.load %arg8[%c8, %c0_13] : memref<64x32xf32, #tpu.memory_space<vmem>>, vector<8x32xf32>
    tpu.vector_store %arg8[%c8, %c0_13], %17 {strides = array<i32>} : memref<64x32xf32, #tpu.memory_space<vmem>>, vector<8x32xf32>,
    %c2 = arith.constant 2 : index
    %c0_14 = arith.constant 0 : index
    %c0_15 = arith.constant 0 : index
    %19 = vector.load %arg0[%c2, %c0_14, %c0_15] : memref<8x8x16xf32, #tpu.memory_space<vmem>>, vector<1x8x16xf32>
    %20 = vector.shape_cast %19 : vector<1x8x16xf32> to vector<8x16xf32>
    %21 = tpu.concatenate %20, %17 in 1 : vector<8x16xf32>, vector<8x32xf32> -> vector<8x48xf32>
    %cst_16 = arith.constant dense<0.000000e+00> : vector<8x32xf32>
    %22 = tpu.matmul %21, %0, %cst_16 {dimension_numbers = #tpu.dot_dimension_numbers<[1], [0], [0], [1], [0, 0, 1, 1], [], []>} : vector<8x48xf32>, vector<48x32xf32>, vector<8x32xf32> -> vector<8x32xf32>
    %23 = vector.broadcast %1 : vector<1x32xf32> to vector<8x32xf32>
    %24 = arith.addf %22, %23 : vector<8x32xf32>
    %25 = math.tanh %24 : vector<8x32xf32>
    %c16 = arith.constant 16 : index
    %c0_17 = arith.constant 0 : index
    %26 = vector.load %arg8[%c16, %c0_17] : memref<64x32xf32, #tpu.memory_space<vmem>>, vector<8x32xf32>
    tpu.vector_store %arg8[%c16, %c0_17], %25 {strides = array<i32>} : memref<64x32xf32, #tpu.memory_space<vmem>>, vector<8x32xf32>,
    %c3 = arith.constant 3 : index
    %c0_18 = arith.constant 0 : index
    %c0_19 = arith.constant 0 : index
    %27 = vector.load %arg0[%c3, %c0_18, %c0_19] : memref<8x8x16xf32, #tpu.memory_space<vmem>>, vector<1x8x16xf32>
    %28 = vector.shape_cast %27 : vector<1x8x16xf32> to vector<8x16xf32>
    %29 = tpu.concatenate %28, %25 in 1 : vector<8x16xf32>, vector<8x32xf32> -> vector<8x48xf32>
    %cst_20 = arith.constant dense<0.000000e+00> : vector<8x32xf32>
    %30 = tpu.matmul %29, %0, %cst_20 {dimension_numbers = #tpu.dot_dimension_numbers<[1], [0], [0], [1], [0, 0, 1, 1], [], []>} : vector<8x48xf32>, vector<48x32xf32>, vector<8x32xf32> -> vector<8x32xf32>
    %31 = vector.broadcast %1 : vector<1x32xf32> to vector<8x32xf32>
    %32 = arith.addf %30, %31 : vector<8x32xf32>
    %33 = math.tanh %32 : vector<8x32xf32>
    %c24 = arith.constant 24 : index
    %c0_21 = arith.constant 0 : index
    %34 = vector.load %arg8[%c24, %c0_21] : memref<64x32xf32, #tpu.memory_space<vmem>>, vector<8x32xf32>
    tpu.vector_store %arg8[%c24, %c0_21], %33 {strides = array<i32>} : memref<64x32xf32, #tpu.memory_space<vmem>>, vector<8x32xf32>,
    %c4 = arith.constant 4 : index
    %c0_22 = arith.constant 0 : index
    %c0_23 = arith.constant 0 : index
    %35 = vector.load %arg0[%c4, %c0_22, %c0_23] : memref<8x8x16xf32, #tpu.memory_space<vmem>>, vector<1x8x16xf32>
    %36 = vector.shape_cast %35 : vector<1x8x16xf32> to vector<8x16xf32>
    %37 = tpu.concatenate %36, %33 in 1 : vector<8x16xf32>, vector<8x32xf32> -> vector<8x48xf32>
    %cst_24 = arith.constant dense<0.000000e+00> : vector<8x32xf32>
    %38 = tpu.matmul %37, %0, %cst_24 {dimension_numbers = #tpu.dot_dimension_numbers<[1], [0], [0], [1], [0, 0, 1, 1], [], []>} : vector<8x48xf32>, vector<48x32xf32>, vector<8x32xf32> -> vector<8x32xf32>
    %39 = vector.broadcast %1 : vector<1x32xf32> to vector<8x32xf32>
    %40 = arith.addf %38, %39 : vector<8x32xf32>
    %41 = math.tanh %40 : vector<8x32xf32>
    %c32 = arith.constant 32 : index
    %c0_25 = arith.constant 0 : index
    %42 = vector.load %arg8[%c32, %c0_25] : memref<64x32xf32, #tpu.memory_space<vmem>>, vector<8x32xf32>
    tpu.vector_store %arg8[%c32, %c0_25], %41 {strides = array<i32>} : memref<64x32xf32, #tpu.memory_space<vmem>>, vector<8x32xf32>,
    %c5 = arith.constant 5 : index
    %c0_26 = arith.constant 0 : index
    %c0_27 = arith.constant 0 : index
    %43 = vector.load %arg0[%c5, %c0_26, %c0_27] : memref<8x8x16xf32, #tpu.memory_space<vmem>>, vector<1x8x16xf32>
    %44 = vector.shape_cast %43 : vector<1x8x16xf32> to vector<8x16xf32>
    %45 = tpu.concatenate %44, %41 in 1 : vector<8x16xf32>, vector<8x32xf32> -> vector<8x48xf32>
    %cst_28 = arith.constant dense<0.000000e+00> : vector<8x32xf32>
    %46 = tpu.matmul %45, %0, %cst_28 {dimension_numbers = #tpu.dot_dimension_numbers<[1], [0], [0], [1], [0, 0, 1, 1], [], []>} : vector<8x48xf32>, vector<48x32xf32>, vector<8x32xf32> -> vector<8x32xf32>
    %47 = vector.broadcast %1 : vector<1x32xf32> to vector<8x32xf32>
    %48 = arith.addf %46, %47 : vector<8x32xf32>
    %49 = math.tanh %48 : vector<8x32xf32>
    %c40 = arith.constant 40 : index
    %c0_29 = arith.constant 0 : index
    %50 = vector.load %arg8[%c40, %c0_29] : memref<64x32xf32, #tpu.memory_space<vmem>>, vector<8x32xf32>
    tpu.vector_store %arg8[%c40, %c0_29], %49 {strides = array<i32>} : memref<64x32xf32, #tpu.memory_space<vmem>>, vector<8x32xf32>,
    %c6 = arith.constant 6 : index
    %c0_30 = arith.constant 0 : index
    %c0_31 = arith.constant 0 : index
    %51 = vector.load %arg0[%c6, %c0_30, %c0_31] : memref<8x8x16xf32, #tpu.memory_space<vmem>>, vector<1x8x16xf32>
    %52 = vector.shape_cast %51 : vector<1x8x16xf32> to vector<8x16xf32>
    %53 = tpu.concatenate %52, %49 in 1 : vector<8x16xf32>, vector<8x32xf32> -> vector<8x48xf32>
    %cst_32 = arith.constant dense<0.000000e+00> : vector<8x32xf32>
    %54 = tpu.matmul %53, %0, %cst_32 {dimension_numbers = #tpu.dot_dimension_numbers<[1], [0], [0], [1], [0, 0, 1, 1], [], []>} : vector<8x48xf32>, vector<48x32xf32>, vector<8x32xf32> -> vector<8x32xf32>
    %55 = vector.broadcast %1 : vector<1x32xf32> to vector<8x32xf32>
    %56 = arith.addf %54, %55 : vector<8x32xf32>
    %57 = math.tanh %56 : vector<8x32xf32>
    %c48 = arith.constant 48 : index
    %c0_33 = arith.constant 0 : index
    %58 = vector.load %arg8[%c48, %c0_33] : memref<64x32xf32, #tpu.memory_space<vmem>>, vector<8x32xf32>
    tpu.vector_store %arg8[%c48, %c0_33], %57 {strides = array<i32>} : memref<64x32xf32, #tpu.memory_space<vmem>>, vector<8x32xf32>,
    %c7 = arith.constant 7 : index
    %c0_34 = arith.constant 0 : index
    %c0_35 = arith.constant 0 : index
    %59 = vector.load %arg0[%c7, %c0_34, %c0_35] : memref<8x8x16xf32, #tpu.memory_space<vmem>>, vector<1x8x16xf32>
    %60 = vector.shape_cast %59 : vector<1x8x16xf32> to vector<8x16xf32>
    %61 = tpu.concatenate %60, %57 in 1 : vector<8x16xf32>, vector<8x32xf32> -> vector<8x48xf32>
    %cst_36 = arith.constant dense<0.000000e+00> : vector<8x32xf32>
    %62 = tpu.matmul %61, %0, %cst_36 {dimension_numbers = #tpu.dot_dimension_numbers<[1], [0], [0], [1], [0, 0, 1, 1], [], []>} : vector<8x48xf32>, vector<48x32xf32>, vector<8x32xf32> -> vector<8x32xf32>
    %63 = vector.broadcast %1 : vector<1x32xf32> to vector<8x32xf32>
    %64 = arith.addf %62, %63 : vector<8x32xf32>
    %65 = math.tanh %64 : vector<8x32xf32>
    %c56 = arith.constant 56 : index
    %c0_37 = arith.constant 0 : index
    %66 = vector.load %arg8[%c56, %c0_37] : memref<64x32xf32, #tpu.memory_space<vmem>>, vector<8x32xf32>
    tpu.vector_store %arg8[%c56, %c0_37], %65 {strides = array<i32>} : memref<64x32xf32, #tpu.memory_space<vmem>>, vector<8x32xf32>,
    %c0_38 = arith.constant 0 : index
    %c0_39 = arith.constant 0 : index
    %67 = vector.load %arg8[%c0_38, %c0_39] : memref<64x32xf32, #tpu.memory_space<vmem>>, vector<64x32xf32>
    %c0_40 = arith.constant 0 : index
    %c0_41 = arith.constant 0 : index
    %68 = vector.load %arg4[%c0_40, %c0_41] : memref<32x6xf32, #tpu.memory_space<vmem>>, vector<32x6xf32>
    %cst_42 = arith.constant dense<0.000000e+00> : vector<64x6xf32>
    %69 = tpu.matmul %67, %68, %cst_42 {dimension_numbers = #tpu.dot_dimension_numbers<[1], [0], [0], [1], [0, 0, 1, 1], [], []>} : vector<64x32xf32>, vector<32x6xf32>, vector<64x6xf32> -> vector<64x6xf32>
    %c0_43 = arith.constant 0 : index
    %c0_44 = arith.constant 0 : index
    %70 = vector.load %arg5[%c0_43, %c0_44] : memref<1x6xf32, #tpu.memory_space<vmem>>, vector<1x6xf32>
    %71 = vector.broadcast %70 : vector<1x6xf32> to vector<64x6xf32>
    %72 = arith.addf %69, %71 : vector<64x6xf32>
    %c0_45 = arith.constant 0 : index
    %c0_46 = arith.constant 0 : index
    %73 = vector.load %arg6[%c0_45, %c0_46] : memref<64x6xf32, #tpu.memory_space<vmem>>, vector<64x6xf32>
    tpu.vector_store %arg6[%c0_45, %c0_46], %72 {strides = array<i32>} : memref<64x6xf32, #tpu.memory_space<vmem>>, vector<64x6xf32>,
    %c0_47 = arith.constant 0 : index
    %c0_48 = arith.constant 0 : index
    %74 = vector.load %arg7[%c0_47, %c0_48] : memref<8x32xf32, #tpu.memory_space<vmem>>, vector<8x32xf32>
    tpu.vector_store %arg7[%c0_47, %c0_48], %65 {strides = array<i32>} : memref<8x32xf32, #tpu.memory_space<vmem>>, vector<8x32xf32>,
    return
  }
}

</mosaic_0001>

<bundles_post_ra>
// kernel: rnn_model_sequence_forward.1
= control target key start
LH: loop header
LB: loop body
LE: loop exit
PB: predicated region body
PF: predicated region fallthrough
CT: control target
= control target key end

     0   :  { %s487_s30 = smov 16   ;;  %s688_s0 = inlined_call_operand.vmem [shape: f32[8,8,16], index: 0, kind: input, shape index: {}]   ;;  %s689_s1 = inlined_call_operand.vmem [shape: f32[8,32], index: 1, kind: input, shape index: {}]   ;;  %s690_s2 = inlined_call_operand.vmem [shape: f32[48,32], index: 2, kind: input, shape index: {}]   ;;  %s691_s3 = inlined_call_operand.vmem [shape: f32[1,32], index: 3, kind: input, shape index: {}]   ;;  %s692_s4 = inlined_call_operand.vmem [shape: f32[32,6], index: 4, kind: input, shape index: {}]   ;;  %s693_s5 = inlined_call_operand.vmem [shape: f32[1,6], index: 5, kind: input, shape index: {}]   ;;  %s694_s6 = inlined_call_operand.vmem [shape: f32[64,6], index: 6, kind: output, shape index: {0}]   ;;  %s695_s7 = inlined_call_operand.hbm [shape: f32[8,32], index: 7, kind: output, shape index: {1}]  }
   0x1   :  { %v33_v0 = vld [vmem:[%s689_s1] sm:$0xff]  ;;  %v31_v1 = vld [vmem:[%s690_s2 + $0x28] sm:$0xff]  ;;  %v29_v3 = vld [vmem:[%s690_s2 + $0x18] sm:$0xff] }
   0x2   :  { %v30_v2 = vld [vmem:[%s690_s2 + $0x20] sm:$0xff]  ;;  %36 = vrot.lane.b32.xlu0 %v33_v0, %s487_s30  ;;  %58 = vmatpush.msra.mxu0 %v31_v1 }
   0x3   :  { %91 = vmatpush.msra.mxu1 %v31_v1  ;;  %123 = vmatpush.msra.mxu2 %v31_v1 }
   0x4   :  { %13 = vsyncpa [#allocation4], 0  ;;  %59 = vmatpush.msra.mxu0 %v30_v2  ;;  %155 = vmatpush.msra.mxu3 %v31_v1  ;;  %v28_v4 = vld [vmem:[%s690_s2 + $0x10] sm:$0xff]  ;;  %v27_v5 = vld [vmem:[%s690_s2 + $0x8] sm:$0xff]  ;;  %vm39_vm0 = vcmask 130048   ;;  %vm44_vm1 = vcmask 392192  }
   0x5   :  { %92 = vmatpush.msra.mxu1 %v30_v2  ;;  %124 = vmatpush.msra.mxu2 %v30_v2  ;;  %v26_v6 = vld [vmem:[%s690_s2] sm:$0xff]  ;;  %vm69_vm2 = vcmask 261120   ;;  %v407_v14 = vld [vmem:[%s688_s0 + $0x8] sm:$0xff]  ;;  %v409_v20 = vld [vmem:[%s688_s0 + $0x10] sm:$0xff]  ;;  %vm376_vm3 = vcmask 48128   ;;  %s488_s26 = smov [#allocation3]  }
   0x6   :  { %60 = vmatpush.msra.mxu0 %v29_v3  ;;  %156 = vmatpush.msra.mxu3 %v30_v2  ;;  %v34_v7 = vld [vmem:[%s688_s0] sm:$0xff]  ;;  %v411_v26 = vld [vmem:[%s688_s0 + $0x18] sm:$0xff]  ;;  %v305_v33 = vld [vmem:[%s692_s4 + $0x10] sm:$0xff]  ;;  %s393_s27 = sshll.u32 %s488_s26, 4  ;;  %s395_s8 = sshll.u32 %s695_s7, 4  ;;  %s394_s27 = int_to_ptr.vmem [resolvable:$true] %s393_s27  ;;  %s396_s8 = int_to_ptr.hbm [resolvable:$true] %s395_s8 }
   0x7   :  { %93 = vmatpush.msra.mxu1 %v29_v3  ;;  %125 = vmatpush.msra.mxu2 %v29_v3  ;;  %v559_v10 = vld [vmem:[%s691_s3] ss:$0 sm:$0xff]  ;;  %v306_v32 = vld [vmem:[%s692_s4 + $0x18] sm:$0xff]  ;;  %v304_v34 = vld [vmem:[%s692_s4 + $0x8] sm:$0xff] }
   0x8   :  { %61 = vmatpush.msra.mxu0 %v28_v4  ;;  %157 = vmatpush.msra.mxu3 %v29_v3  ;;  %v303_v35 = vld [vmem:[%s692_s4] sm:$0xff]  ;;  %v415_v49 = vld [vmem:[%s688_s0 + $0x28] sm:$0xff]  ;;  %v417_v61 = vld [vmem:[%s688_s0 + $0x30] sm:$0xff] }
   0x9   :  { %94 = vmatpush.msra.mxu1 %v28_v4  ;;  %126 = vmatpush.msra.mxu2 %v28_v4  ;;  %v413_v36 = vld [vmem:[%s688_s0 + $0x20] sm:$0xff] }
   0xa   :  { %62 = vmatpush.msra.mxu0 %v27_v5  ;;  %158 = vmatpush.msra.mxu3 %v28_v4  ;;  %v611_v43 = vld [vmem:[%s693_s5] ss:$0 sm:$0xff] }
   0xb   :  { %95 = vmatpush.msra.mxu1 %v27_v5  ;;  %127 = vmatpush.msra.mxu2 %v27_v5 }
   0xc   :  { %159 = vmatpush.msra.mxu3 %v27_v5  ;;  %63 = vmatpush.msra.mxu0 %v26_v6 }
   0xd   :  { %96 = vmatpush.msra.mxu1 %v26_v6  ;;  %128 = vmatpush.msra.mxu2 %v26_v6 }
   0xe   :  { %160 = vmatpush.msra.mxu3 %v26_v6  ;;  %187 = vmatpush.msrb.mxu0 %v31_v1 }
   0xf   :  { %219 = vmatpush.msrb.mxu1 %v31_v1  ;;  %251 = vmatpush.msrb.mxu2 %v31_v1 }
  0x10   :  { %283 = vmatpush.msrb.mxu3 %v31_v1  ;;  %188 = vmatpush.msrb.mxu0 %v30_v2 }
  0x11   :  { %220 = vmatpush.msrb.mxu1 %v30_v2  ;;  %252 = vmatpush.msrb.mxu2 %v30_v2 }
  0x12   :  { %284 = vmatpush.msrb.mxu3 %v30_v2  ;;  %189 = vmatpush.msrb.mxu0 %v29_v3 }
  0x13   :  { %221 = vmatpush.msrb.mxu1 %v29_v3  ;;  %253 = vmatpush.msrb.mxu2 %v29_v3 }
  0x14   :  { %285 = vmatpush.msrb.mxu3 %v29_v3  ;;  %190 = vmatpush.msrb.mxu0 %v28_v4 }
  0x15   :  { %222 = vmatpush.msrb.mxu1 %v28_v4  ;;  %254 = vmatpush.msrb.mxu2 %v28_v4 }
  0x16   :  { %286 = vmatpush.msrb.mxu3 %v28_v4  ;;  %191 = vmatpush.msrb.mxu0 %v27_v5 }
  0x17   :  { %223 = vmatpush.msrb.mxu1 %v27_v5  ;;  %255 = vmatpush.msrb.mxu2 %v27_v5 }
  0x18   :  { %287 = vmatpush.msrb.mxu3 %v27_v5  ;;  %192 = vmatpush.msrb.mxu0 %v26_v6 }
  0x19   :  { %224 = vmatpush.msrb.mxu1 %v26_v6  ;;  %256 = vmatpush.msrb.mxu2 %v26_v6 }
  0x1a   :  { %288 = vmatpush.msrb.mxu3 %v26_v6 }
  0x74   :  { %v37_v8 = vpop.permute.xlu0 %36 }
  0x75   :  { %v40_v9 = vsel %vm39_vm0, %v34_v7, %v37_v8 }
  0x76   :  { %406 = vmatmul.msk.f32.vlgmr.msra.gmra.mxu0 %vm44_vm1, %v40_v9  ;;  %v419_v9 = vld [vmem:[%s688_s0 + $0x38] sm:$0xff] }
  0x77   :  { %347 = vmatpush.msra.mxu0 %v306_v32 }
  0x79   :  { %348 = vmatpush.msra.mxu0 %v305_v33 }
  0x7b   :  { %349 = vmatpush.msra.mxu0 %v304_v34 }
  0x7d   :  { %350 = vmatpush.msra.mxu0 %v303_v35 }
  0xf3   :  { %v65_v11 = vpop.f32.mrf.mxu0 }
  0xf4   :  { %v66_v12 = vadd.f32 %v559_v10, %v65_v11 }
  0xf6   :  { %445 = vtanh.f32 %v66_v12 }
  0xfc   :  { %v446_v13 = vpop.eup %445 }
  0xfd   :  { %70 = vst.msk [vmem:[#allocation2] sm:$0xff] %vm69_vm2, %v446_v13  ;;  %74 = vrot.lane.b32.xlu0 %v446_v13, %s487_s30 }
 0x104   :  { %v295_v39 = vld [vmem:[#allocation2] sm:$0xff] }
 0x16f   :  { %v75_v15 = vpop.permute.xlu0 %74 }
 0x170   :  { %v77_v16 = vsel %vm39_vm0, %v407_v14, %v75_v15 }
 0x171   :  { %408 = vmatmul.msk.f32.vlgmr.msra.gmra.mxu1 %vm44_vm1, %v77_v16 }
 0x172   :  { %429 = vmatpush.msra.mxu1 %v306_v32 }
 0x174   :  { %432 = vmatpush.msra.mxu1 %v305_v33 }
 0x176   :  { %435 = vmatpush.msra.mxu1 %v304_v34 }
 0x178   :  { %438 = vmatpush.msra.mxu1 %v303_v35 }
 0x1ee   :  { %v98_v17 = vpop.f32.mrf.mxu1 }
 0x1ef   :  { %v99_v18 = vadd.f32 %v559_v10, %v98_v17 }
 0x1f1   :  { %447 = vtanh.f32 %v99_v18 }
 0x1f7   :  { %v448_v19 = vpop.eup %447 }
 0x1f8   :  { %102 = vst.msk [vmem:[#allocation2 + $0x8] sm:$0xff] %vm69_vm2, %v448_v19  ;;  %106 = vrot.lane.b32.xlu1 %v448_v19, %s487_s30 }
 0x1ff   :  { %v296_v40 = vld [vmem:[#allocation2 + $0x8] sm:$0xff] }
 0x26a   :  { %v107_v21 = vpop.permute.xlu1 %106 }
 0x26b   :  { %v109_v22 = vsel %vm39_vm0, %v409_v20, %v107_v21 }
 0x26c   :  { %410 = vmatmul.msk.f32.vlgmr.msra.gmra.mxu2 %vm44_vm1, %v109_v22 }
 0x26d   :  { %430 = vmatpush.msra.mxu2 %v306_v32 }
 0x26f   :  { %433 = vmatpush.msra.mxu2 %v305_v33 }
 0x271   :  { %436 = vmatpush.msra.mxu2 %v304_v34 }
 0x273   :  { %439 = vmatpush.msra.mxu2 %v303_v35 }
 0x2ef   :  { %v130_v23 = vpop.f32.mrf.mxu2 }
 0x2f0   :  { %v131_v24 = vadd.f32 %v559_v10, %v130_v23 }
 0x2f2   :  { %449 = vtanh.f32 %v131_v24 }
 0x2f8   :  { %v450_v25 = vpop.eup %449 }
 0x2f9   :  { %134 = vst.msk [vmem:[#allocation2 + $0x10] sm:$0xff] %vm69_vm2, %v450_v25  ;;  %138 = vrot.lane.b32.xlu1 %v450_v25, %s487_s30 }
 0x300   :  { %v297_v52 = vld [vmem:[#allocation2 + $0x10] sm:$0xff] }
 0x36b   :  { %v139_v27 = vpop.permute.xlu1 %138 }
 0x36c   :  { %v141_v28 = vsel %vm39_vm0, %v411_v26, %v139_v27 }
 0x36d   :  { %412 = vmatmul.msk.f32.vlgmr.msra.gmra.mxu3 %vm44_vm1, %v141_v28 }
 0x36e   :  { %431 = vmatpush.msra.mxu3 %v306_v32 }
 0x370   :  { %434 = vmatpush.msra.mxu3 %v305_v33 }
 0x372   :  { %437 = vmatpush.msra.mxu3 %v304_v34 }
 0x374   :  { %440 = vmatpush.msra.mxu3 %v303_v35 }
 0x3f0   :  { %v162_v29 = vpop.f32.mrf.mxu3 }
 0x3f1   :  { %v163_v30 = vadd.f32 %v559_v10, %v162_v29 }
 0x3f3   :  { %451 = vtanh.f32 %v163_v30 }
 0x3f9   :  { %v452_v31 = vpop.eup %451 }
 0x3fa   :  { %166 = vst.msk [vmem:[#allocation2 + $0x18] sm:$0xff] %vm69_vm2, %v452_v31  ;;  %170 = vrot.lane.b32.xlu2 %v452_v31, %s487_s30 }
 0x401   :  { %v298_v53 = vld [vmem:[#allocation2 + $0x18] sm:$0xff] }
 0x454   :  { %v171_v37 = vpop.permute.xlu2 %170 }
 0x455   :  { %v173_v38 = vsel %vm39_vm0, %v413_v36, %v171_v37 }
 0x456   :  { %414 = vmatmul.msk.f32.vlgmr.msrb.gmra.mxu0 %vm44_vm1, %v173_v38 }
 0x45e   :  { %421 = vmatmul.msk.f32.vlgmr.msra.gmra.mxu0 %vm69_vm2, %v295_v39 }
 0x466   :  { %422 = vmatmul.msk.f32.gmra.mxu0 %vm69_vm2, %v296_v40 }
 0x4d3   :  { %v194_v41 = vpop.f32.mrf.mxu0 }
 0x4d4   :  { %v195_v42 = vadd.f32 %v559_v10, %v194_v41 }
 0x4d6   :  { %453 = vtanh.f32 %v195_v42 }
 0x4db   :  { %v352_v44 = vpop.f32.mrf.mxu0 }
 0x4dc   :  { %v454_v45 = vpop.eup %453  ;;  %v353_v46 = vadd.f32 %v611_v43, %v352_v44 }
 0x4dd   :  { %198 = vst.msk [vmem:[#allocation2 + $0x20] sm:$0xff] %vm69_vm2, %v454_v45  ;;  %202 = vrot.lane.b32.xlu2 %v454_v45, %s487_s30 }
 0x4de   :  { %377 = vst.msk [vmem:[%s694_s6] sm:$0xff] %vm376_vm3, %v353_v46 }
 0x4e3   :  { %v355_v47 = vpop.f32.mrf.mxu0 }
 0x4e4   :  { %v356_v48 = vadd.f32 %v611_v43, %v355_v47  ;;  %v299_v0 = vld [vmem:[#allocation2 + $0x20] sm:$0xff] }
 0x4e6   :  { %378 = vst.msk [vmem:[%s694_s6 + $0x8] sm:$0xff] %vm376_vm3, %v356_v48 }
 0x537   :  { %v203_v50 = vpop.permute.xlu2 %202 }
 0x538   :  { %v205_v51 = vsel %vm39_vm0, %v415_v49, %v203_v50 }
 0x539   :  { %416 = vmatmul.msk.f32.vlgmr.msrb.gmra.mxu1 %vm44_vm1, %v205_v51 }
 0x541   :  { %423 = vmatmul.msk.f32.vlgmr.msra.gmra.mxu1 %vm69_vm2, %v297_v52 }
 0x549   :  { %424 = vmatmul.msk.f32.gmra.mxu1 %vm69_vm2, %v298_v53 }
 0x5b6   :  { %v226_v54 = vpop.f32.mrf.mxu1 }
 0x5b7   :  { %v227_v55 = vadd.f32 %v559_v10, %v226_v54 }
 0x5b9   :  { %455 = vtanh.f32 %v227_v55 }
 0x5be   :  { %v358_v56 = vpop.f32.mrf.mxu1 }
 0x5bf   :  { %v456_v57 = vpop.eup %455  ;;  %v359_v58 = vadd.f32 %v611_v43, %v358_v56 }
 0x5c0   :  { %230 = vst.msk [vmem:[#allocation2 + $0x28] sm:$0xff] %vm69_vm2, %v456_v57  ;;  %234 = vrot.lane.b32.xlu0 %v456_v57, %s487_s30 }
 0x5c1   :  { %379 = vst.msk [vmem:[%s694_s6 + $0x10] sm:$0xff] %vm376_vm3, %v359_v58 }
 0x5c6   :  { %v361_v59 = vpop.f32.mrf.mxu1 }
 0x5c7   :  { %v362_v60 = vadd.f32 %v611_v43, %v361_v59  ;;  %v300_v1 = vld [vmem:[#allocation2 + $0x28] sm:$0xff] }
 0x5c9   :  { %380 = vst.msk [vmem:[%s694_s6 + $0x18] sm:$0xff] %vm376_vm3, %v362_v60 }
 0x632   :  { %v235_v62 = vpop.permute.xlu0 %234 }
 0x633   :  { %v237_v63 = vsel %vm39_vm0, %v417_v61, %v235_v62 }
 0x634   :  { %418 = vmatmul.msk.f32.vlgmr.msrb.gmra.mxu2 %vm44_vm1, %v237_v63 }
 0x63c   :  { %425 = vmatmul.msk.f32.vlgmr.msra.gmra.mxu2 %vm69_vm2, %v299_v0 }
 0x644   :  { %426 = vmatmul.msk.f32.gmra.mxu2 %vm69_vm2, %v300_v1 }
 0x6b7   :  { %v258_v2 = vpop.f32.mrf.mxu2 }
 0x6b8   :  { %v259_v3 = vadd.f32 %v559_v10, %v258_v2 }
 0x6ba   :  { %457 = vtanh.f32 %v259_v3 }
 0x6bf   :  { %v364_v4 = vpop.f32.mrf.mxu2 }
 0x6c0   :  { %v458_v5 = vpop.eup %457  ;;  %v365_v6 = vadd.f32 %v611_v43, %v364_v4 }
 0x6c1   :  { %262 = vst.msk [vmem:[#allocation2 + $0x30] sm:$0xff] %vm69_vm2, %v458_v5  ;;  %266 = vrot.lane.b32.xlu1 %v458_v5, %s487_s30 }
 0x6c2   :  { %381 = vst.msk [vmem:[%s694_s6 + $0x20] sm:$0xff] %vm376_vm3, %v365_v6 }
 0x6c7   :  { %v367_v7 = vpop.f32.mrf.mxu2 }
 0x6c8   :  { %v368_v8 = vadd.f32 %v611_v43, %v367_v7  ;;  %v301_v13 = vld [vmem:[#allocation2 + $0x30] sm:$0xff] }
 0x6ca   :  { %382 = vst.msk [vmem:[%s694_s6 + $0x28] sm:$0xff] %vm376_vm3, %v368_v8 }
 0x733   :  { %v267_v11 = vpop.permute.xlu1 %266 }
 0x734   :  { %v269_v12 = vsel %vm39_vm0, %v419_v9, %v267_v11 }
 0x735   :  { %420 = vmatmul.msk.f32.vlgmr.msrb.gmra.mxu3 %vm44_vm1, %v269_v12 }
 0x73d   :  { %427 = vmatmul.msk.f32.vlgmr.msra.gmra.mxu3 %vm69_vm2, %v301_v13 }
 0x7b8   :  { %v290_v14 = vpop.f32.mrf.mxu3 }
 0x7b9   :  { %v291_v15 = vadd.f32 %v559_v10, %v290_v14 }
 0x7bb   :  { %459 = vtanh.f32 %v291_v15 }
 0x7c0   :  { %v370_v16 = vpop.f32.mrf.mxu3 }
 0x7c1   :  { %v460_v17 = vpop.eup %459  ;;  %v371_v18 = vadd.f32 %v611_v43, %v370_v16 }
 0x7c2   :  { %294 = vst.msk [vmem:[#allocation2 + $0x38] sm:$0xff] %vm69_vm2, %v460_v17 }
 0x7c3   :  { %385 = vst.msk [vmem:[#allocation3] sm:$0xff] %vm69_vm2, %v460_v17 }
 0x7c4   :  { %383 = vst.msk [vmem:[%s694_s6 + $0x30] sm:$0xff] %vm376_vm3, %v371_v18  ;;  %398 = dma.vmem_to_hbm [thread:$0]  %s394_s27, 128, %s396_s8, [#allocation4]  }
 0x7c9   :  { %v302_v19 = vld [vmem:[#allocation2 + $0x38] sm:$0xff] }
 0x7ca   :  { %428 = vmatmul.msk.f32.gmra.mxu3 %vm69_vm2, %v302_v19 }
 0x84d   :  { %v373_v10 = vpop.f32.mrf.mxu3 }
 0x84e   :  { %v374_v20 = vadd.f32 %v611_v43, %v373_v10 }
 0x850   :  { %384 = vst.msk [vmem:[%s694_s6 + $0x38] sm:$0xff] %vm376_vm3, %v374_v20 }
 0x851   :  { %485 = dma.done.wait [#allocation4], 128  }
 0x852   :  { %486 = vsyncadd [#allocation4], 4294967168 }
 0x853   :  { %405 = vsyncpa [#allocation4], 1 }

</bundles_post_ra>
